<compile_context>
chip_gen: v6e
topology: v6e:2x2x1
jax: 0.10.0
libtpu: 0.0.40
codegen_flags: <defaults>
</compile_context>

<pallas_src>
import math
from functools import partial

import numpy as np
import jax
import jax.numpy as jnp
from jax.experimental import pallas as pl
from jax.experimental.pallas import tpu as pltpu

NUM_HEADS = 4


# ----------------------------------------------------------------------------
# Fused Q|K|V node projection pre-pass (computed once, not once per dst tile)
# ----------------------------------------------------------------------------
def _qkv_proj_kernel(nf_ref, w_ref, qkv_ref):
    # one MXU matmul filling 3*HD output lanes; bf16 operands, f32 accumulation
    qkv_ref[...] = jnp.dot(nf_ref[...], w_ref[...],
                           preferred_element_type=jnp.float32)


def _row_tile(n, cap=512):
    """Largest row tile dividing n: n itself if small, else a multiple of 8 <= cap."""
    if n <= cap:
        return n
    best = None
    for t in range(8, cap + 1, 8):
        if n % t == 0:
            best = t
    return best if best is not None else n


def _project_qkv(nf_bf16, w_qkv_bf16):
    N, F_in = nf_bf16.shape
    HD3 = w_qkv_bf16.shape[1]
    tp = _row_tile(N)
    return pl.pallas_call(
        _qkv_proj_kernel,
        grid=(N // tp,),
        in_specs=[
            pl.BlockSpec((tp, F_in), lambda i: (i, 0)),
            pl.BlockSpec((F_in, HD3), lambda i: (0, 0)),
        ],
        out_specs=pl.BlockSpec((tp, HD3), lambda i: (i, 0)),
        out_shape=jax.ShapeDtypeStruct((N, HD3), jnp.float32),
        compiler_params=pltpu.CompilerParams(dimension_semantics=("parallel",)),
    )(nf_bf16, w_qkv_bf16)


# ----------------------------------------------------------------------------
# Main kernel: one dst-node tile of the multi-head edge-conditioned attention
# ----------------------------------------------------------------------------
def _mha_attn_kernel(q_ref, k_ref, v_ref, ef_ref, mask_ref, we_ref, hbd_ref,
                     h_ref, e_ref, *, num_heads):
    T, HD = q_ref.shape                 # dst tile size, num_heads * num_output_feats
    N = k_ref.shape[0]                  # number of (src) nodes
    D = HD // num_heads                 # per-head feature dim
    f32 = jnp.float32

    # 1/sqrt(D) folded onto the small [T, HD] q tile (score = clip(q*k/sqrt(D)))
    q = q_ref[...] * (1.0 / math.sqrt(D))                                   # [T, HD]
    k = k_ref[...]                                                          # [N, HD]
    v = v_ref[...]                                                          # [N, HD]

    # per-edge projection (all heads at once): bf16 operands, f32 accumulation.
    # ef was pre-masked by the adjacency on the host, so off-edge rows are zero.
    pe = jnp.dot(ef_ref[...], we_ref[...], preferred_element_type=f32)      # [T*N, HD]
    pe3 = pe.reshape(T, N, HD)          # leading-dim split: layout-free

    # broadcasts (no one-hot replication matmuls): q over src, k over dst
    score3 = jnp.clip(q[:, None, :] * k[None, :, :], -5.0, 5.0) * pe3       # [T, N, HD]

    # e_out: off-edge entries are already exactly zero (pe == 0 there)
    e_ref[...] = score3.reshape(T * N, HD)

    # per-head sum over D, broadcast back over D: resident block-diag ones (f32, exact)
    s3 = jnp.dot(score3.reshape(T * N, HD), hbd_ref[...],
                 preferred_element_type=f32).reshape(T, N, HD)              # [T, N, HD]
    alpha3 = jnp.exp(jnp.clip(s3, -5.0, 5.0)) * mask_ref[...][:, :, None]   # [T, N, HD]

    # aggregate over src per dst: sublane (XLU) reductions, not one-hot matmuls
    wv = jnp.sum(alpha3 * v[None, :, :], axis=1)                            # [T, HD]
    z = jnp.sum(alpha3, axis=1)                                             # [T, HD]

    # exact division for parity with the PyTorch module (tiny [T, HD] tensor)
    h_ref[...] = wv / (z + 1e-6)


# ----------------------------------------------------------------------------
# dst-tile auto-sizing from the per-step VMEM footprint (v7x-safe budget)
# ----------------------------------------------------------------------------
def _pick_dst_tile(N, F_in, HD, budget_bytes=20 * 2 ** 20, cap=256):
    best = None
    for t in range(1, min(N, cap) + 1):
        if N % t:
            continue
        if t != N and t % 8:
            continue
        step_bytes = (2 * t * N * F_in * 2      # streamed bf16 edge-feat block (x2 bufs)
                      + 2 * t * N * 4           # streamed f32 mask block
                      + 2 * t * N * HD * 4      # e_out block
                      + 6 * t * N * HD * 4)     # live [T, N, HD] f32 intermediates
        if step_bytes <= budget_bytes:
            best = t
    if best is None:
        best = 8 if N % 8 == 0 else N
    return best


# ----------------------------------------------------------------------------
# Wrapper: host-side weight/layout prep + dst-tiled pallas_call
# ----------------------------------------------------------------------------
def multi_head_attention(node_feats, edge_feats_dense, adj_mask, params, *,
                         tile_dst=None):
    N, F_in = node_feats.shape
    HD = params["wq"].shape[1]
    D = HD // NUM_HEADS
    bf16, f32 = jnp.bfloat16, jnp.float32
    assert N % 8 == 0, "node count must be a multiple of 8 (sublane tiling)"

    T = _pick_dst_tile(N, F_in, HD) if tile_dst is None else tile_dst
    assert N % T == 0, "tile_dst must divide the node count"

    # ---- host-side prep (layout plumbing, fused into the dtype casts) ----
    nf = node_feats.astype(bf16)
    w_qkv = jnp.concatenate([params["wq"], params["wk"], params["wv"]],
                            axis=1).astype(bf16)                    # [F_in, 3*HD]
    we = params["we"].astype(bf16)
    # adjacency folded into the bf16 cast of the dense edge features:
    # off-edge proj_e (and hence e_out) becomes exactly zero at no in-kernel cost.
    ef = (edge_feats_dense * adj_mask[:, :, None]).reshape(N * N, F_in).astype(bf16)
    mask = adj_mask.astype(f32)                                     # [N, N] lane-dense
    # grid-invariant per-head block-diagonal ones (sum over D + broadcast back)
    hidx = jnp.arange(HD) // D
    head_bd = (hidx[:, None] == hidx[None, :]).astype(f32)          # [HD, HD]

    # fused Q|K|V projection: computed once for the whole graph (Pallas pre-pass)
    qkv = _project_qkv(nf, w_qkv)                                   # [N, 3*HD] f32
    q, k, v = qkv[:, :HD], qkv[:, HD:2 * HD], qkv[:, 2 * HD:]

    tiled = lambda shape: pl.BlockSpec(shape, lambda i: (i, 0))      # streamed per dst tile
    resident = lambda shape: pl.BlockSpec(shape, lambda i: (0, 0))   # resident across tiles

    kernel = partial(_mha_attn_kernel, num_heads=NUM_HEADS)
    h_out, e_out = pl.pallas_call(
        kernel,
        grid=(N // T,),
        in_specs=[
            tiled((T, HD)),             # q rows of this dst tile
            resident((N, HD)),          # k (all src nodes)
            resident((N, HD)),          # v (all src nodes)
            tiled((T * N, F_in)),       # masked dense edge feats, dst-major pair rows
            tiled((T, N)),              # adjacency mask rows of this dst tile
            resident((F_in, HD)),       # W_e (edge projection)
            resident((HD, HD)),         # per-head block-diagonal ones
        ],
        out_specs=(
            tiled((T, HD)),             # h_out
            tiled((T * N, HD)),         # e_out (dst-major pair rows)
        ),
        out_shape=(
            jax.ShapeDtypeStruct((N, HD), jnp.float32),
            jax.ShapeDtypeStruct((N * N, HD), jnp.float32),
        ),
        compiler_params=pltpu.CompilerParams(
            dimension_semantics=("parallel",),     # dst tiles independent (megacore splits)
            vmem_limit_bytes=48 * 1024 * 1024,     # v7x-safe; can go ~112 MiB on v5e/v6e
        ),
    )(q, k, v, ef, mask, we, head_bd)
    return h_out, e_out


# ----------------------------------------------------------------------------
# Pure-JAX reference mirroring the PyTorch module's forward
# (projections use bf16 operands / f32 accumulation to match the kernel's MXU dtypes)
# ----------------------------------------------------------------------------
def mha_reference(node_feats, edge_feats_dense, adj_mask, params):
    N, F_in = node_feats.shape
    H = NUM_HEADS
    HD = params["wq"].shape[1]
    D = HD // H
    bf, f32 = jnp.bfloat16, jnp.float32
    nf = node_feats.astype(bf)
    ef = edge_feats_dense.reshape(N * N, F_in).astype(bf)

    q = jnp.dot(nf, params["wq"].astype(bf), preferred_element_type=f32).reshape(N, H, D)
    k = jnp.dot(nf, params["wk"].astype(bf), preferred_element_type=f32).reshape(N, H, D)
    v = jnp.dot(nf, params["wv"].astype(bf), preferred_element_type=f32).reshape(N, H, D)
    pe = jnp.dot(ef, params["we"].astype(bf),
                 preferred_element_type=f32).reshape(N, N, H, D)

    score = k[None, :, :, :] * q[:, None, :, :]                  # [dst, src, H, D]
    score = jnp.clip(score / math.sqrt(D), -5.0, 5.0)
    score = score * pe
    e_out = score * adj_mask[:, :, None, None]                   # defined on edges only
    s = jnp.clip(jnp.sum(score, axis=-1), -5.0, 5.0)             # [dst, src, H]
    alpha = jnp.exp(s) * adj_mask[:, :, None]
    wV = jnp.sum(alpha[:, :, :, None] * v[None, :, :, :], axis=1)  # [dst, H, D]
    z = jnp.sum(alpha, axis=1)                                   # [dst, H]
    h_out = wV / (z[:, :, None] + 1e-6)
    return h_out.reshape(N, HD), e_out.reshape(N * N, HD)


if __name__ == "__main__":
    key = jax.random.PRNGKey(0)
    N = 16                      # nodes
    F_IN = 32                   # num_input_feats
    D_OUT = 8                   # num_output_feats (per head)
    HD = NUM_HEADS * D_OUT      # 32
    k_nf, k_ef, kq, kk, kv, ke = jax.random.split(key, 6)

    def init_w(k, shape):
        # TODO(synk): glorot_orthogonal init not replicated (init-time only).
        return jax.random.normal(k, shape, jnp.float32) / math.sqrt(shape[0])

    params = dict(
        wq=init_w(kq, (F_IN, HD)),
        wk=init_w(kk, (F_IN, HD)),
        wv=init_w(kv, (F_IN, HD)),
        we=init_w(ke, (F_IN, HD)),
    )
    node_feats = jax.random.normal(k_nf, (N, F_IN), jnp.float32)
    edge_feats_dense = jax.random.normal(k_ef, (N, N, F_IN), jnp.float32)

    # deterministic simple graph: self-loops + ring edges src->(src+1)%N, src->(src+3)%N
    src = jnp.arange(N)
    adj = jnp.zeros((N, N), jnp.float32)
    adj = adj.at[(src + 1) % N, src].set(1.0)
    adj = adj.at[(src + 3) % N, src].set(1.0)
    adj = adj.at[src, src].set(1.0)

    h_want, e_want = mha_reference(node_feats, edge_feats_dense, adj, params)

    # run once with the auto-sized tile (single dst tile at this size) and once with a
    # forced smaller tile to exercise the multi-step grid / index maps.
    for td in (None, 8):
        h_out, e_out = multi_head_attention(node_feats, edge_feats_dense, adj, params,
                                            tile_dst=td)
        h_out, e_out = jax.block_until_ready((h_out, e_out))

        assert h_out.shape == (N, HD) and e_out.shape == (N * N, HD)
        assert bool(jnp.all(jnp.isfinite(h_out))) and bool(jnp.all(jnp.isfinite(e_out)))

        # structural-correctness check against the module-faithful reference
        np.testing.assert_allclose(np.asarray(h_out), np.asarray(h_want),
                                   rtol=2e-2, atol=2e-2)
        np.testing.assert_allclose(np.asarray(e_out), np.asarray(e_want),
                                   rtol=2e-2, atol=2e-2)

    print("KERNEL_OK")
</pallas_src>

<mosaic_0001>
module attributes {stable_mosaic.version = 11 : i64} {
  func.func @_qkv_proj_kernel(%arg0: i32, %arg1: memref<16x32xbf16, #tpu.memory_space<vmem>>, %arg2: memref<32x96xbf16, #tpu.memory_space<vmem>>, %arg3: memref<16x96xf32, #tpu.memory_space<vmem>>) attributes {dimension_semantics = [#tpu.dimension_semantics<parallel>], iteration_bounds = array<i64: 1>, scalar_prefetch = 0 : i64, scratch_operands = 0 : i64, tpu.core_type = #tpu.core_type<tc>, window_params = [{transform_indices = @transform_0, window_bounds = array<i64: 16, 32>}, {pipeline_mode = #tpu.pipeline_mode<synchronous>, transform_indices = @transform_1, window_bounds = array<i64: 32, 96>}, {transform_indices = @transform_2, window_bounds = array<i64: 16, 96>}]} {
    %c0 = arith.constant 0 : index
    %c0_0 = arith.constant 0 : index
    %0 = vector.load %arg1[%c0, %c0_0] : memref<16x32xbf16, #tpu.memory_space<vmem>>, vector<16x32xbf16>
    %c0_1 = arith.constant 0 : index
    %c0_2 = arith.constant 0 : index
    %1 = vector.load %arg2[%c0_1, %c0_2] : memref<32x96xbf16, #tpu.memory_space<vmem>>, vector<32x96xbf16>
    %cst = arith.constant dense<0.000000e+00> : vector<16x96xf32>
    %2 = tpu.matmul %0, %1, %cst {dimension_numbers = #tpu.dot_dimension_numbers<[1], [0], [0], [1], [0, 0, 1, 1], [], []>} : vector<16x32xbf16>, vector<32x96xbf16>, vector<16x96xf32> -> vector<16x96xf32>
    %c0_3 = arith.constant 0 : index
    %c0_4 = arith.constant 0 : index
    %3 = vector.load %arg3[%c0_3, %c0_4] : memref<16x96xf32, #tpu.memory_space<vmem>>, vector<16x96xf32>
    tpu.vector_store %arg3[%c0_3, %c0_4], %2 {strides = array<i32>} : memref<16x96xf32, #tpu.memory_space<vmem>>, vector<16x96xf32>,
    return
  }
  func.func @transform_0(%arg0: i32) -> (i32, i32) {
    %c0_i32 = arith.constant 0 : i32
    %c0_i32_0 = arith.constant 0 : i32
    return %arg0, %c0_i32 : i32, i32
  }
  func.func @transform_1(%arg0: i32) -> (i32, i32) {
    %c0_i32 = arith.constant 0 : i32
    %c0_i32_0 = arith.constant 0 : i32
    %c0_i32_1 = arith.constant 0 : i32
    return %c0_i32, %c0_i32_0 : i32, i32
  }
  func.func @transform_2(%arg0: i32) -> (i32, i32) {
    %c0_i32 = arith.constant 0 : i32
    %c0_i32_0 = arith.constant 0 : i32
    return %arg0, %c0_i32 : i32, i32
  }
}

</mosaic_0001>

<bundles_post_ra>
// kernel: tpu_custom_call.1
= control target key start
LH: loop header
LB: loop body
LE: loop exit
PB: predicated region body
PF: predicated region fallthrough
CT: control target
= control target key end

     0   :  { %7 = vsyncpa [#allocation3], 0  ;;  %s256_s0 = inlined_call_operand.hbm [shape: bf16[16,32], index: 0, kind: input, shape index: {}]   ;;  %s257_s1 = inlined_call_operand.hbm [shape: bf16[32,96], index: 1, kind: input, shape index: {}]   ;;  %s258_s2 = inlined_call_operand.hbm [shape: f32[16,96], index: 2, kind: output, shape index: {}]  }
   0x1   :  { %8 = vsyncpa [#allocation6], 0 }
   0x2   :  { %9 = vsyncpa [#allocation4], 0  ;;  %s223_s9 = smov [#allocation2]  }
   0x3   :  { %s15_s10 = sshll.u32 %s223_s9, 4  ;;  %s16_s10 = int_to_ptr.vmem [resolvable:$true] %s15_s10 }
   0x4   :  { %s165_s11 = scalar_lea.vmem %s16_s10, 128  ;;  %p170_p1 = scmp.lt.s32.totalorder %s16_s10, %s16_s10 }
   0x5   :  { %p166_p0 = scmp.ne.s32.totalorder %s16_s10, %s165_s11  ;;  %p171_p2 = scmp.lt.s32.totalorder %s165_s11, %s165_s11 }
   0x7   :  { %p172_p3 = por %p171_p2, %p170_p1 }
   0x9   :  { %p173_p4 = pnand %p172_p3, %p166_p0 }
   0xb   :  { %176 = shalt.err (!%p173_p4)
}
   0xc   :  { %s224_s12 = smov 64   ;;  %s225_s13 = smov 4  }
   0xd   :  { %21 = dma.hbm_to_vmem [thread:$0]  %s256_s0, 128, %s16_s10, [#allocation3], %s224_s12, %s224_s12, %s225_s13  }
   0xe   :  { %s226_s16 = smov [#allocation5]  }
   0xf   :  { %s27_s17 = sshll.u32 %s226_s16, 4  ;;  %s28_s17 = int_to_ptr.vmem [resolvable:$true] %s27_s17 }
  0x10   :  { %s185_s18 = scalar_lea.vmem %s28_s17, 256  ;;  %p190_p6 = scmp.lt.s32.totalorder %s28_s17, %s28_s17 }
  0x11   :  { %p186_p5 = scmp.ne.s32.totalorder %s28_s17, %s185_s18  ;;  %p191_p7 = scmp.lt.s32.totalorder %s185_s18, %s185_s18 }
  0x13   :  { %p192_p8 = por %p191_p7, %p190_p6 }
  0x15   :  { %p193_p9 = pnand %p192_p8, %p186_p5 }
  0x17   :  { %196 = shalt.err (!%p193_p9)
}
  0x18   :  { %33 = dma.hbm_to_vmem [thread:$0]  %s257_s1, 256, %s28_s17, [#allocation6], %s224_s12, %s224_s12, %s225_s13  }
  0x19   :  { %217 = dma.done.wait [#allocation3], 128  }
  0x1a   :  { %218 = vsyncadd [#allocation3], 4294967168 }
  0x1b   :  { %219 = dma.done.wait [#allocation6], 256  }
  0x1c   :  { %220 = vsyncadd [#allocation6], 4294967040  ;;  %v227_v0 = vmov 0.0   ;;  %vm228_vm0 = vmmov 0   ;;  %v154_v1 = vld [vmem:[#allocation5 + $0x8] sm:$0xff]   ;;  %v155_v2 = vld [vmem:[#allocation5] sm:$0xff]  }
  0x1d   :  { %137 = vmatprep.subr.bf16.mxu0 %v227_v0  ;;  %141 = vmatprep.mubr.msk.bf16.mxu0 %vm228_vm0, %v227_v0  ;;  %v156_v3 = vld [vmem:[#allocation2] sm:$0xff]   ;;  %vm64_vm1 = vcmask 261120   ;;  %vm109_vm2 = vcmask 785408   ;;  %s229_s0 = smov [#allocation7]  }
  0x1e   :  { %138 = vmatpush3.bf16.msra.mxu0 %v154_v1  ;;  %s117_s21 = sshll.u32 %s229_s0, 4  ;;  %s118_s21 = int_to_ptr.vmem [resolvable:$true] %s117_s21 }
  0x1f   :  { %139 = vmatprep.subr.bf16.mxu0 %v227_v0  ;;  %s197_s1 = scalar_lea.vmem %s118_s21, 256  ;;  %p202_p11 = scmp.lt.s32.totalorder %s118_s21, %s118_s21 }
  0x20   :  { %p198_p10 = scmp.ne.s32.totalorder %s118_s21, %s197_s1  ;;  %p203_p12 = scmp.lt.s32.totalorder %s197_s1, %s197_s1 }
  0x22   :  { %140 = vmatpush3.bf16.msra.mxu0 %v155_v2  ;;  %p204_p13 = por %p203_p12, %p202_p11 }
  0x24   :  { %p205_p0 = pnand %p204_p13, %p198_p10 }
  0x25   :  { %142 = vmatmul.mubr.msk.bf16.vlgmr.msra.gmra.mxu0 %vm64_vm1, %v156_v3 }
  0xe5   :  { %v102_v4 = vpop.f32.mrf.mxu0 }
  0xe6   :  { %110 = vst.msk [vmem:[#allocation7] sm:$0xff] %vm109_vm2, %v102_v4 }
  0xe7   :  { %v143_v5 = vpop.f32.mrf.mxu0 }
  0xe9   :  { %v105_v6 = vpop.f32.mrf.mxu0 }
  0xea   :  { %111 = vst.msk [vmem:[#allocation7 + $0x8] sm:$0xff] %vm109_vm2, %v105_v6 }
  0xeb   :  { %v144_v7 = vpop.f32.mrf.mxu0 }
  0xec   :  { %208 = shalt.err (!%p205_p0)
}
  0xed   :  { %s230_s22 = smov 128   ;;  %s231_s23 = smov 8  }
  0xee   :  { %123 = dma.vmem_to_hbm [thread:$0]  %s118_s21, 256, %s258_s2, [#allocation4], %s230_s22, %s230_s22, %s231_s23  }
  0xef   :  { %221 = dma.done.wait [#allocation4], 256  }
  0xf0   :  { %222 = vsyncadd [#allocation4], 4294967040 }
  0xf1   :  { %127 = vsyncpa [#allocation3], 1 }
  0xf2   :  { %128 = vsyncpa [#allocation6], 1 }
  0xf3   :  { %129 = vsyncpa [#allocation4], 1 }

</bundles_post_ra>
